<compile_context>
chip_gen: v6e
topology: v6e:2x2x1
jax: 0.10.0
libtpu: 0.0.40
codegen_flags: <defaults>
</compile_context>

<pallas_src>
import functools

import numpy as np
import jax
import jax.numpy as jnp
from jax.experimental import pallas as pl
from jax.experimental.pallas import tpu as pltpu

# toy config (consistent with the module's constructor args)
S = 8          # sequence length
B = 2          # batch size
INP = 32       # inp_size
UNIT = 16      # attention_unit
HOPS = 4       # attention_hops
PAD_IDX = 0    # dictionary.word2idx['<pad>']


# ------------------------------- Pallas kernel -------------------------------

def crossself_kernel(x1_ref, x2_ref, raw1_ref, raw2_ref,
                     ws1_ref, ws2_ref, ipm_ref,
                     grp_ref, sel_ref, bsum_ref, hsel_ref,
                     attn_ref, rr_ref, adist_ref,
                     *, pad_idx, n_batch, n_hops):
    """Single invocation: both towers' fwd() + combine_hops() for all batches."""
    bh = n_batch * n_hops

    # ---- stack both towers: tokens (tower, seq, batch) on sublanes, features on lanes
    x_all = jnp.concatenate([x1_ref[...], x2_ref[...]], axis=0)           # (2*S*B, H)
    raw_all = jnp.concatenate([raw1_ref[...], raw2_ref[...]], axis=1)     # (1, 2*S*B)

    # ---- ws1/ws2 for EVERY (tower, batch, seq) token: two fused matmuls
    x_fm = jnp.transpose(x_all)                       # (H, NT) one in-kernel XLU transpose
    hbar = jnp.tanh(jnp.dot(ws1_ref[...], x_fm,
                            preferred_element_type=jnp.float32))          # (U, NT)
    sc = jnp.dot(ws2_ref[...], hbar,
                 preferred_element_type=jnp.float32)                      # (hops, NT)

    # ---- block-diagonal masked softmax over the lane (token) axis
    # rows r = (tower, batch, hop); grp_ref is 0 on the row's own (tower,batch) tokens
    # and -1e30 elsewhere, so off-block lanes exp() to exactly 0 and each row's
    # softmax equals the reference per-(batch,hop) softmax over its S positions.
    padf = (raw_all == pad_idx).astype(jnp.float32)                       # (1, NT)
    pen = (jnp.concatenate([sc] * (2 * n_batch), axis=0)                  # (R, NT)
           + grp_ref[...] - 10000.0 * padf)
    m = jnp.max(pen, axis=-1, keepdims=True)
    e = jnp.exp(pen - m)
    inv = pl.reciprocal(jnp.sum(e, axis=-1, keepdims=True), approx=True)
    alphas = e * inv                                                      # (R, NT)

    # ---- pooled representations + dense attention maps: two matmuls for everything
    agg = jnp.dot(alphas, x_all, preferred_element_type=jnp.float32)      # (R, H)
    attn_ref[...] = jnp.dot(alphas, sel_ref[...],
                            preferred_element_type=jnp.float32)           # (R, S)

    # ---- combine_hops: adist = softmax_k(tanh(sum_H r1 * IPM(r2))); r = adist @ r
    r1a = agg[:bh]                                                        # (B*hops, H)
    r2a = agg[bh:]                                                        # (B*hops, H)
    ipm_r2 = jax.lax.dot_general(r2a, ipm_ref[...], (((1,), (1,)), ((), ())),
                                 preferred_element_type=jnp.float32)      # r2 @ W_ipm^T
    # tanh output is in [-1, 1] -> exp needs no max shift
    e2 = jnp.exp(jnp.tanh(jnp.sum(r1a * ipm_r2, axis=-1, keepdims=True)))  # (B*hops, 1)
    inv2 = pl.reciprocal(jnp.dot(bsum_ref[...], e2,
                                 preferred_element_type=jnp.float32),
                         approx=True)                                      # (B, 1)
    r1c = jnp.dot(bsum_ref[...], e2 * r1a,
                  preferred_element_type=jnp.float32) * inv2               # (B, H)
    r2c = jnp.dot(bsum_ref[...], e2 * r2a,
                  preferred_element_type=jnp.float32) * inv2               # (B, H)
    rr_ref[...] = jnp.concatenate([r1c, r2c], axis=0)                      # (2B, H) slab
    adist_ref[...] = jnp.dot(bsum_ref[...], e2 * hsel_ref[...],
                             preferred_element_type=jnp.float32) * inv2    # (B, hops)


# --------------------- trace-time selector / mask constants -------------------

def _selector_constants(s, b, hops):
    """0/1 selector matrices; depend only on static shapes (baked as constants)."""
    n = s * b                      # tokens per tower, ordered (seq-major, batch-minor)
    nt = 2 * n                     # both towers
    r = 2 * b * hops               # rows ordered (tower, batch, hop)
    rows = np.arange(r)
    cols = np.arange(nt)
    t_r = rows // (b * hops)
    b_r = (rows // hops) % b
    t_c = cols // n
    b_c = cols % b
    in_grp = (t_r[:, None] == t_c[None, :]) & (b_r[:, None] == b_c[None, :])
    grp = np.where(in_grp, 0.0, -1e30).astype(np.float32)                  # (R, NT)
    s_c = (cols % n) // b
    sel = (s_c[:, None] == np.arange(s)[None, :]).astype(np.float32)       # (NT, S)
    j = np.arange(b * hops)
    bsum = (np.arange(b)[:, None] == (j // hops)[None, :]).astype(np.float32)   # (B, B*hops)
    hsel = ((j % hops)[:, None] == np.arange(hops)[None, :]).astype(np.float32)  # (B*hops, hops)
    return grp, sel, bsum, hsel


# ------------------------------ wrapper (glue) --------------------------------

def crossself_forward(params, input1, input2, raw1, raw2, pad_idx=PAD_IDX):
    # input1/input2: (S, B, H) float32 ; raw1/raw2: (S, B) int token ids
    s, b, h = input1.shape
    hops, u = params['ws2'].shape
    n = s * b

    # free layout glue only: contiguous-collapse reshapes (no transpose/stack copies)
    x1 = input1.reshape(n, h)
    x2 = input2.reshape(n, h)
    ids1 = raw1.reshape(1, n).astype(jnp.int32)
    ids2 = raw2.reshape(1, n).astype(jnp.int32)

    grp, sel, bsum, hsel = _selector_constants(s, b, hops)

    kernel = functools.partial(crossself_kernel, pad_idx=pad_idx,
                               n_batch=b, n_hops=hops)
    vmem = pl.BlockSpec(memory_space=pltpu.MemorySpace.VMEM)   # whole array in VMEM
    out_shape = (
        jax.ShapeDtypeStruct((2 * b * hops, s), jnp.float32),  # a1/a2 merged
        jax.ShapeDtypeStruct((2 * b, h), jnp.float32),         # [r1; r2] slab
        jax.ShapeDtypeStruct((b, hops), jnp.float32),          # adist (hops on lanes)
    )
    attn, rr, adist = pl.pallas_call(
        kernel,
        out_shape=out_shape,
        in_specs=[vmem] * 11,
        out_specs=(vmem, vmem, vmem),
    )(x1, x2, ids1, ids2,
      params['ws1'], params['ws2'], params['ipm'],
      jnp.asarray(grp), jnp.asarray(sel), jnp.asarray(bsum), jnp.asarray(hsel))

    attn = attn.reshape(2, b, hops, s)
    return rr[:b], rr[b:], [attn[0], attn[1]], adist


# --------------------------- pure-JAX reference -------------------------------

def _ref_forward(params, input1, input2, raw1, raw2, pad_idx=PAD_IDX):
    def fwd(inp, raw):
        x = jnp.transpose(inp, (1, 0, 2))                          # (B,S,H)
        bq, sq, hq = x.shape
        hbar = jnp.tanh(x.reshape(-1, hq) @ params['ws1'].T)       # (B*S,U)
        alphas = (hbar @ params['ws2'].T).reshape(bq, sq, -1)      # (B,S,hops)
        alphas = jnp.transpose(alphas, (0, 2, 1))                  # (B,hops,S)
        mask = (jnp.transpose(raw, (1, 0)) == pad_idx).astype(jnp.float32)[:, None, :]
        pen = alphas + (-10000.0) * mask
        a = jax.nn.softmax(pen.reshape(-1, sq), axis=1).reshape(bq, -1, sq)
        return jnp.einsum('bks,bsh->bkh', a, x), a
    r1, a1 = fwd(input1, raw1)
    r2, a2 = fwd(input2, raw2)
    ipm_r2 = jnp.einsum('bkh,jh->bkj', r2, params['ipm'])          # r2 @ W^T
    adist = jax.nn.softmax(jnp.tanh(jnp.sum(r1 * ipm_r2, axis=2)), axis=1)
    r1c = jnp.einsum('bk,bkh->bh', adist, r1)
    r2c = jnp.einsum('bk,bkh->bh', adist, r2)
    return r1c, r2c, [a1, a2], adist


# ----------------------------------- main -------------------------------------

if __name__ == "__main__":
    key = jax.random.PRNGKey(0)
    k1, k2, k3, k4, k5, k6, k7 = jax.random.split(key, 7)

    params = {
        'ws1': 0.2 * jax.random.normal(k1, (UNIT, INP), jnp.float32),   # nn.Linear(INP,UNIT)
        'ws2': 0.2 * jax.random.normal(k2, (HOPS, UNIT), jnp.float32),  # nn.Linear(UNIT,HOPS)
        'ipm': 0.2 * jax.random.normal(k3, (INP, INP), jnp.float32),    # nn.Linear(INP,INP)
    }
    input1 = 0.5 * jax.random.normal(k4, (S, B, INP), jnp.float32)
    input2 = 0.5 * jax.random.normal(k5, (S, B, INP), jnp.float32)
    raw1 = jax.random.randint(k6, (S, B), 1, 50, dtype=jnp.int32)
    raw2 = jax.random.randint(k7, (S, B), 1, 50, dtype=jnp.int32)
    raw1 = raw1.at[6:, 1].set(PAD_IDX)     # pad tail of one sequence per tower
    raw2 = raw2.at[5:, 0].set(PAD_IDX)

    fwd_fn = jax.jit(crossself_forward)
    r1, r2, attns, adist = fwd_fn(params, input1, input2, raw1, raw2)
    jax.block_until_ready((r1, r2, attns[0], attns[1], adist))

    er1, er2, eattns, eadist = _ref_forward(params, input1, input2, raw1, raw2)
    assert r1.shape == (B, INP) and r2.shape == (B, INP)
    assert attns[0].shape == (B, HOPS, S) and attns[1].shape == (B, HOPS, S)
    assert adist.shape == (B, HOPS)
    for got, want in ((r1, er1), (r2, er2), (attns[0], eattns[0]),
                      (attns[1], eattns[1]), (adist, eadist)):
        assert jnp.allclose(got, want, rtol=2e-2, atol=2e-2), \
            float(jnp.max(jnp.abs(got - want)))

    print("KERNEL_OK")
</pallas_src>

<mosaic_0001>
module attributes {stable_mosaic.version = 11 : i64} {
  func.func @crossself_kernel(%arg0: memref<16x32xf32, #tpu.memory_space<vmem>>, %arg1: memref<16x32xf32, #tpu.memory_space<vmem>>, %arg2: memref<1x16xi32, #tpu.memory_space<vmem>>, %arg3: memref<1x16xi32, #tpu.memory_space<vmem>>, %arg4: memref<16x32xf32, #tpu.memory_space<vmem>>, %arg5: memref<4x16xf32, #tpu.memory_space<vmem>>, %arg6: memref<32x32xf32, #tpu.memory_space<vmem>>, %arg7: memref<16x32xf32, #tpu.memory_space<vmem>>, %arg8: memref<32x8xf32, #tpu.memory_space<vmem>>, %arg9: memref<2x8xf32, #tpu.memory_space<vmem>>, %arg10: memref<8x4xf32, #tpu.memory_space<vmem>>, %arg11: memref<16x8xf32, #tpu.memory_space<vmem>>, %arg12: memref<4x32xf32, #tpu.memory_space<vmem>>, %arg13: memref<2x4xf32, #tpu.memory_space<vmem>>) attributes {dimension_semantics = [], scalar_prefetch = 0 : i64, scratch_operands = 0 : i64, tpu.core_type = #tpu.core_type<tc>} {
    %c0 = arith.constant 0 : index
    %c0_0 = arith.constant 0 : index
    %0 = vector.load %arg0[%c0, %c0_0] : memref<16x32xf32, #tpu.memory_space<vmem>>, vector<16x32xf32>
    %c0_1 = arith.constant 0 : index
    %c0_2 = arith.constant 0 : index
    %1 = vector.load %arg1[%c0_1, %c0_2] : memref<16x32xf32, #tpu.memory_space<vmem>>, vector<16x32xf32>
    %2 = tpu.concatenate %0, %1 in 0 : vector<16x32xf32>, vector<16x32xf32> -> vector<32x32xf32>
    %c0_3 = arith.constant 0 : index
    %c0_4 = arith.constant 0 : index
    %3 = vector.load %arg2[%c0_3, %c0_4] : memref<1x16xi32, #tpu.memory_space<vmem>>, vector<1x16xi32>
    %c0_5 = arith.constant 0 : index
    %c0_6 = arith.constant 0 : index
    %4 = vector.load %arg3[%c0_5, %c0_6] : memref<1x16xi32, #tpu.memory_space<vmem>>, vector<1x16xi32>
    %5 = tpu.concatenate %3, %4 in 1 : vector<1x16xi32>, vector<1x16xi32> -> vector<1x32xi32>
    %6 = tpu.transpose %2, [1, 0] : vector<32x32xf32> -> vector<32x32xf32>
    %c0_7 = arith.constant 0 : index
    %c0_8 = arith.constant 0 : index
    %7 = vector.load %arg4[%c0_7, %c0_8] : memref<16x32xf32, #tpu.memory_space<vmem>>, vector<16x32xf32>
    %cst = arith.constant dense<0.000000e+00> : vector<16x32xf32>
    %8 = tpu.matmul %7, %6, %cst {dimension_numbers = #tpu.dot_dimension_numbers<[1], [0], [0], [1], [0, 0, 1, 1], [], []>} : vector<16x32xf32>, vector<32x32xf32>, vector<16x32xf32> -> vector<16x32xf32>
    %9 = math.tanh %8 : vector<16x32xf32>
    %c0_9 = arith.constant 0 : index
    %c0_10 = arith.constant 0 : index
    %10 = vector.load %arg5[%c0_9, %c0_10] : memref<4x16xf32, #tpu.memory_space<vmem>>, vector<4x16xf32>
    %cst_11 = arith.constant dense<0.000000e+00> : vector<4x32xf32>
    %11 = tpu.matmul %10, %9, %cst_11 {dimension_numbers = #tpu.dot_dimension_numbers<[1], [0], [0], [1], [0, 0, 1, 1], [], []>} : vector<4x16xf32>, vector<16x32xf32>, vector<4x32xf32> -> vector<4x32xf32>
    %c0_i32 = arith.constant 0 : i32
    %12 = vector.broadcast %c0_i32 : i32 to vector<1x32xi32>
    %13 = arith.cmpi eq, %5, %12 : vector<1x32xi32>
    %14 = arith.extui %13 : vector<1x32xi1> to vector<1x32xi32>
    %15 = arith.sitofp %14 : vector<1x32xi32> to vector<1x32xf32>
    %16 = tpu.concatenate %11, %11, %11, %11 in 0 : vector<4x32xf32>, vector<4x32xf32>, vector<4x32xf32>, vector<4x32xf32> -> vector<16x32xf32>
    %c0_12 = arith.constant 0 : index
    %c0_13 = arith.constant 0 : index
    %17 = vector.load %arg7[%c0_12, %c0_13] : memref<16x32xf32, #tpu.memory_space<vmem>>, vector<16x32xf32>
    %18 = arith.addf %16, %17 : vector<16x32xf32>
    %cst_14 = arith.constant 1.000000e+04 : f32
    %19 = vector.broadcast %cst_14 : f32 to vector<1x32xf32>
    %20 = arith.mulf %19, %15 : vector<1x32xf32>
    %21 = vector.broadcast %20 : vector<1x32xf32> to vector<16x32xf32>
    %22 = arith.subf %18, %21 : vector<16x32xf32>
    %cst_15 = arith.constant dense<0xFF800000> : vector<16xf32>
    %23 = vector.multi_reduction <maximumf>, %22, %cst_15 [1] : vector<16x32xf32> to vector<16xf32>
    %24 = vector.shape_cast %23 : vector<16xf32> to vector<16x1xf32>
    %25 = vector.broadcast %24 : vector<16x1xf32> to vector<16x32xf32>
    %26 = arith.subf %22, %25 : vector<16x32xf32>
    %27 = math.exp %26 : vector<16x32xf32>
    %cst_16 = arith.constant dense<0.000000e+00> : vector<16xf32>
    %28 = vector.multi_reduction <add>, %27, %cst_16 [1] : vector<16x32xf32> to vector<16xf32>
    %29 = vector.shape_cast %28 : vector<16xf32> to vector<16x1xf32>
    %30 = tpu.reciprocal %29 {approx = true} : vector<16x1xf32> -> vector<16x1xf32>
    %31 = vector.broadcast %30 : vector<16x1xf32> to vector<16x32xf32>
    %32 = arith.mulf %27, %31 : vector<16x32xf32>
    %cst_17 = arith.constant dense<0.000000e+00> : vector<16x32xf32>
    %33 = tpu.matmul %32, %2, %cst_17 {dimension_numbers = #tpu.dot_dimension_numbers<[1], [0], [0], [1], [0, 0, 1, 1], [], []>} : vector<16x32xf32>, vector<32x32xf32>, vector<16x32xf32> -> vector<16x32xf32>
    %c0_18 = arith.constant 0 : index
    %c0_19 = arith.constant 0 : index
    %34 = vector.load %arg8[%c0_18, %c0_19] : memref<32x8xf32, #tpu.memory_space<vmem>>, vector<32x8xf32>
    %cst_20 = arith.constant dense<0.000000e+00> : vector<16x8xf32>
    %35 = tpu.matmul %32, %34, %cst_20 {dimension_numbers = #tpu.dot_dimension_numbers<[1], [0], [0], [1], [0, 0, 1, 1], [], []>} : vector<16x32xf32>, vector<32x8xf32>, vector<16x8xf32> -> vector<16x8xf32>
    %c0_21 = arith.constant 0 : index
    %c0_22 = arith.constant 0 : index
    %36 = vector.load %arg11[%c0_21, %c0_22] : memref<16x8xf32, #tpu.memory_space<vmem>>, vector<16x8xf32>
    tpu.vector_store %arg11[%c0_21, %c0_22], %35 {strides = array<i32>} : memref<16x8xf32, #tpu.memory_space<vmem>>, vector<16x8xf32>,
    %37 = vector.extract_strided_slice %33 {offsets = [0, 0], sizes = [8, 32], strides = [1, 1]} : vector<16x32xf32> to vector<8x32xf32>
    %38 = vector.extract_strided_slice %33 {offsets = [8, 0], sizes = [8, 32], strides = [1, 1]} : vector<16x32xf32> to vector<8x32xf32>
    %c0_23 = arith.constant 0 : index
    %c0_24 = arith.constant 0 : index
    %39 = vector.load %arg6[%c0_23, %c0_24] : memref<32x32xf32, #tpu.memory_space<vmem>>, vector<32x32xf32>
    %cst_25 = arith.constant dense<0.000000e+00> : vector<8x32xf32>
    %40 = tpu.matmul %38, %39, %cst_25 {dimension_numbers = #tpu.dot_dimension_numbers<[1], [1], [0], [0], [0, 0, 1, 0], [], []>} : vector<8x32xf32>, vector<32x32xf32>, vector<8x32xf32> -> vector<8x32xf32>
    %41 = arith.mulf %37, %40 : vector<8x32xf32>
    %cst_26 = arith.constant dense<0.000000e+00> : vector<8xf32>
    %42 = vector.multi_reduction <add>, %41, %cst_26 [1] : vector<8x32xf32> to vector<8xf32>
    %43 = vector.shape_cast %42 : vector<8xf32> to vector<8x1xf32>
    %44 = math.tanh %43 : vector<8x1xf32>
    %45 = math.exp %44 : vector<8x1xf32>
    %c0_27 = arith.constant 0 : index
    %c0_28 = arith.constant 0 : index
    %46 = vector.load %arg9[%c0_27, %c0_28] : memref<2x8xf32, #tpu.memory_space<vmem>>, vector<2x8xf32>
    %cst_29 = arith.constant dense<0.000000e+00> : vector<2x1xf32>
    %47 = tpu.matmul %46, %45, %cst_29 {dimension_numbers = #tpu.dot_dimension_numbers<[1], [0], [0], [1], [0, 0, 1, 1], [], []>} : vector<2x8xf32>, vector<8x1xf32>, vector<2x1xf32> -> vector<2x1xf32>
    %48 = tpu.reciprocal %47 {approx = true} : vector<2x1xf32> -> vector<2x1xf32>
    %c0_30 = arith.constant 0 : index
    %c0_31 = arith.constant 0 : index
    %49 = vector.load %arg9[%c0_30, %c0_31] : memref<2x8xf32, #tpu.memory_space<vmem>>, vector<2x8xf32>
    %50 = vector.broadcast %45 : vector<8x1xf32> to vector<8x32xf32>
    %51 = arith.mulf %50, %37 : vector<8x32xf32>
    %cst_32 = arith.constant dense<0.000000e+00> : vector<2x32xf32>
    %52 = tpu.matmul %49, %51, %cst_32 {dimension_numbers = #tpu.dot_dimension_numbers<[1], [0], [0], [1], [0, 0, 1, 1], [], []>} : vector<2x8xf32>, vector<8x32xf32>, vector<2x32xf32> -> vector<2x32xf32>
    %53 = vector.broadcast %48 : vector<2x1xf32> to vector<2x32xf32>
    %54 = arith.mulf %52, %53 : vector<2x32xf32>
    %c0_33 = arith.constant 0 : index
    %c0_34 = arith.constant 0 : index
    %55 = vector.load %arg9[%c0_33, %c0_34] : memref<2x8xf32, #tpu.memory_space<vmem>>, vector<2x8xf32>
    %56 = vector.broadcast %45 : vector<8x1xf32> to vector<8x32xf32>
    %57 = arith.mulf %56, %38 : vector<8x32xf32>
    %cst_35 = arith.constant dense<0.000000e+00> : vector<2x32xf32>
    %58 = tpu.matmul %55, %57, %cst_35 {dimension_numbers = #tpu.dot_dimension_numbers<[1], [0], [0], [1], [0, 0, 1, 1], [], []>} : vector<2x8xf32>, vector<8x32xf32>, vector<2x32xf32> -> vector<2x32xf32>
    %59 = vector.broadcast %48 : vector<2x1xf32> to vector<2x32xf32>
    %60 = arith.mulf %58, %59 : vector<2x32xf32>
    %61 = tpu.concatenate %54, %60 in 0 : vector<2x32xf32>, vector<2x32xf32> -> vector<4x32xf32>
    %c0_36 = arith.constant 0 : index
    %c0_37 = arith.constant 0 : index
    %62 = vector.load %arg12[%c0_36, %c0_37] : memref<4x32xf32, #tpu.memory_space<vmem>>, vector<4x32xf32>
    tpu.vector_store %arg12[%c0_36, %c0_37], %61 {strides = array<i32>} : memref<4x32xf32, #tpu.memory_space<vmem>>, vector<4x32xf32>,
    %c0_38 = arith.constant 0 : index
    %c0_39 = arith.constant 0 : index
    %63 = vector.load %arg9[%c0_38, %c0_39] : memref<2x8xf32, #tpu.memory_space<vmem>>, vector<2x8xf32>
    %c0_40 = arith.constant 0 : index
    %c0_41 = arith.constant 0 : index
    %64 = vector.load %arg10[%c0_40, %c0_41] : memref<8x4xf32, #tpu.memory_space<vmem>>, vector<8x4xf32>
    %65 = vector.broadcast %45 : vector<8x1xf32> to vector<8x4xf32>
    %66 = arith.mulf %65, %64 : vector<8x4xf32>
    %cst_42 = arith.constant dense<0.000000e+00> : vector<2x4xf32>
    %67 = tpu.matmul %63, %66, %cst_42 {dimension_numbers = #tpu.dot_dimension_numbers<[1], [0], [0], [1], [0, 0, 1, 1], [], []>} : vector<2x8xf32>, vector<8x4xf32>, vector<2x4xf32> -> vector<2x4xf32>
    %68 = vector.broadcast %48 : vector<2x1xf32> to vector<2x4xf32>
    %69 = arith.mulf %67, %68 : vector<2x4xf32>
    %c0_43 = arith.constant 0 : index
    %c0_44 = arith.constant 0 : index
    %70 = vector.load %arg13[%c0_43, %c0_44] : memref<2x4xf32, #tpu.memory_space<vmem>>, vector<2x4xf32>
    tpu.vector_store %arg13[%c0_43, %c0_44], %69 {strides = array<i32>} : memref<2x4xf32, #tpu.memory_space<vmem>>, vector<2x4xf32>,
    return
  }
}

</mosaic_0001>

<bundles_post_ra>
// kernel: crossself_forward.1
= control target key start
LH: loop header
LB: loop body
LE: loop exit
PB: predicated region body
PF: predicated region fallthrough
CT: control target
= control target key end

     0   :  { %19 = vsyncpa [#allocation3], 0  ;;  %s1425_s0 = inlined_call_operand.hbm [shape: f32[16,32], index: 0, kind: input, shape index: {}]   ;;  %s1426_s1 = inlined_call_operand.vmem [shape: f32[16,32], index: 1, kind: input, shape index: {}]   ;;  %s1427_s2 = inlined_call_operand.vmem [shape: s32[1,16], index: 2, kind: input, shape index: {}]   ;;  %s1428_s3 = inlined_call_operand.vmem [shape: s32[1,16], index: 3, kind: input, shape index: {}]   ;;  %s1429_s4 = inlined_call_operand.hbm [shape: f32[16,32], index: 4, kind: input, shape index: {}]   ;;  %s1430_s5 = inlined_call_operand.hbm [shape: f32[4,16], index: 5, kind: input, shape index: {}]   ;;  %s1431_s6 = inlined_call_operand.vmem [shape: f32[32,32], index: 6, kind: input, shape index: {}]   ;;  %s1432_s7 = inlined_call_operand.hbm [shape: f32[16,32], index: 7, kind: input, shape index: {}]   ;;  %s1433_s8 = inlined_call_operand.hbm [shape: f32[32,8], index: 8, kind: input, shape index: {}]   ;;  %s1434_s9 = inlined_call_operand.vmem [shape: f32[2,8], index: 9, kind: input, shape index: {}]   ;;  %s1435_s10 = inlined_call_operand.vmem [shape: f32[8,4], index: 10, kind: input, shape index: {}]   ;;  %s1436_s11 = inlined_call_operand.vmem [shape: f32[16,8], index: 11, kind: output, shape index: {0}]   ;;  %s1437_s12 = inlined_call_operand.vmem [shape: f32[4,32], index: 12, kind: output, shape index: {1}]   ;;  %s1438_s13 = inlined_call_operand.hbm [shape: f32[2,4], index: 13, kind: output, shape index: {2}]  }
   0x1   :  { %20 = vsyncpa [#allocation6], 0 }
   0x2   :  { %21 = vsyncpa [#allocation9], 0 }
   0x3   :  { %22 = vsyncpa [#allocation4], 0  ;;  %s1216_s25 = smov [#allocation5]   ;;  %s1217_s27 = smov [#allocation8]  }
   0x4   :  { %s46_s26 = sshll.u32 %s1216_s25, 4  ;;  %s70_s28 = sshll.u32 %s1217_s27, 4  ;;  %s47_s26 = int_to_ptr.vmem [resolvable:$true] %s46_s26  ;;  %s71_s28 = int_to_ptr.vmem [resolvable:$true] %s70_s28 }
   0x5   :  { %s1096_s29 = scalar_lea.vmem %s47_s26, 256  ;;  %p1101_p1 = scmp.lt.s32.totalorder %s47_s26, %s47_s26 }
   0x6   :  { %p1097_p0 = scmp.ne.s32.totalorder %s47_s26, %s1096_s29  ;;  %p1102_p2 = scmp.lt.s32.totalorder %s1096_s29, %s1096_s29 }
   0x8   :  { %p1103_p3 = por %p1102_p2, %p1101_p1 }
   0xa   :  { %p1104_p4 = pnand %p1103_p3, %p1097_p0 }
   0xc   :  { %1107 = shalt.err (!%p1104_p4)
}
   0xd   :  { %s1218_s30 = smov 128   ;;  %s1219_s14 = smov 8  }
   0xe   :  { %52 = dma.hbm_to_vmem [thread:$0]  %s1429_s4, 256, %s47_s26, [#allocation6], %s1218_s30, %s1218_s30, %s1219_s14  }
   0xf   :  { %s1116_s17 = scalar_lea.vmem %s71_s28, 256  ;;  %p1121_p6 = scmp.lt.s32.totalorder %s71_s28, %s71_s28 }
  0x10   :  { %p1117_p5 = scmp.ne.s32.totalorder %s71_s28, %s1116_s17  ;;  %p1122_p7 = scmp.lt.s32.totalorder %s1116_s17, %s1116_s17 }
  0x12   :  { %p1123_p8 = por %p1122_p7, %p1121_p6 }
  0x14   :  { %p1124_p9 = pnand %p1123_p8, %p1117_p5 }
  0x16   :  { %1127 = shalt.err (!%p1124_p9)
}
  0x17   :  { %76 = dma.hbm_to_vmem [thread:$0]  %s1432_s7, 256, %s71_s28, [#allocation9], %s1218_s30, %s1218_s30, %s1219_s14  }
  0x18   :  { %s1220_s20 = smov [#allocation2]   ;;  %s1221_s22 = smov [#allocation7]  }
  0x19   :  { %s28_s21 = sshll.u32 %s1220_s20, 4  ;;  %s59_s23 = sshll.u32 %s1221_s22, 4  ;;  %s29_s21 = int_to_ptr.vmem [resolvable:$true] %s28_s21  ;;  %s60_s23 = int_to_ptr.vmem [resolvable:$true] %s59_s23 }
  0x1a   :  { %s1136_s4 = scalar_lea.vmem %s29_s21, 256  ;;  %p1141_p11 = scmp.lt.s32.totalorder %s29_s21, %s29_s21 }
  0x1b   :  { %p1137_p10 = scmp.ne.s32.totalorder %s29_s21, %s1136_s4  ;;  %p1142_p12 = scmp.lt.s32.totalorder %s1136_s4, %s1136_s4 }
  0x1d   :  { %p1143_p13 = por %p1142_p12, %p1141_p11 }
  0x1f   :  { %p1144_p0 = pnand %p1143_p13, %p1137_p10 }
  0x21   :  { %1147 = shalt.err (!%p1144_p0)
}
  0x22   :  { %34 = dma.hbm_to_vmem [thread:$0]  %s1425_s0, 256, %s29_s21, [#allocation3], %s1218_s30, %s1218_s30, %s1219_s14  }
  0x23   :  { %s1156_s7 = scalar_lea.vmem %s60_s23, 64  ;;  %p1161_p2 = scmp.lt.s32.totalorder %s60_s23, %s60_s23 }
  0x24   :  { %p1157_p1 = scmp.ne.s32.totalorder %s60_s23, %s1156_s7  ;;  %p1162_p3 = scmp.lt.s32.totalorder %s1156_s7, %s1156_s7 }
  0x26   :  { %p1163_p4 = por %p1162_p3, %p1161_p2 }
  0x28   :  { %p1164_p5 = pnand %p1163_p4, %p1157_p1 }
  0x2a   :  { %1167 = shalt.err (!%p1164_p5)
}
  0x2b   :  { %62 = dma.hbm_to_vmem [thread:$0]  %s1430_s5, 64, %s60_s23, [#allocation6]  }
  0x2c   :  { %s1222_s28 = smov [#allocation10]  }
  0x2d   :  { %s82_s29 = sshll.u32 %s1222_s28, 4  ;;  %s83_s29 = int_to_ptr.vmem [resolvable:$true] %s82_s29 }
  0x2e   :  { %s1176_s15 = scalar_lea.vmem %s83_s29, 512  ;;  %p1181_p7 = scmp.lt.s32.totalorder %s83_s29, %s83_s29 }
  0x2f   :  { %p1177_p6 = scmp.ne.s32.totalorder %s83_s29, %s1176_s15  ;;  %p1182_p8 = scmp.lt.s32.totalorder %s1176_s15, %s1176_s15 }
  0x31   :  { %p1183_p9 = por %p1182_p8, %p1181_p7 }
  0x33   :  { %p1184_p10 = pnand %p1183_p9, %p1177_p6 }
  0x35   :  { %1187 = shalt.err (!%p1184_p10)
}
  0x36   :  { %88 = dma.hbm_to_vmem [thread:$0]  %s1433_s8, 512, %s83_s29, [#allocation9], %s1218_s30, %s1218_s30, %s1219_s14  }
  0x37   :  { %1208 = dma.done.wait [#allocation3], 256  }
  0x38   :  { %1209 = vsyncadd [#allocation3], 4294967040 }
  0x39   :  { %1210 = dma.done.wait [#allocation6], 320  }
  0x3a   :  { %1211 = vsyncadd [#allocation6], 4294966976 }
  0x3b   :  { %1212 = dma.done.wait [#allocation9], 768  }
  0x3c   :  { %1213 = vsyncadd [#allocation9], 4294966528  ;;  %vm124_vm0 = vcmask 261120   ;;  %v111_v0 = vld [vmem:[%s1426_s1 + $0x8] sm:$0xff]  ;;  %v110_v1 = vld [vmem:[%s1426_s1] sm:$0xff]  ;;  %v1223_v6 = vmov 0.0   ;;  %v307_v16 = vlaneseq }
  0x3d   :  { %985 = vmatprep.subr.msk.mxu0 %vm124_vm0, %v111_v0  ;;  %v122_v2 = vld [vmem:[#allocation5] sm:$0xff]  ;;  %v109_v3 = vld [vmem:[#allocation2 + $0x8] sm:$0xff]  ;;  %v108_v4 = vld [vmem:[#allocation2] sm:$0xff]  ;;  %996 = vmatprep.subr.mxu1 %v1223_v6  ;;  %vm1224_vm1 = vmmov 0   ;;  %s1225_s30 = smov 16   ;;  %vm120_vm2 = vcmask 130048  }
  0x3e   :  { %986 = vmatpush3.xpose.msk.msra.mxu0 %vm124_vm0, %v111_v0  ;;  %993 = vmatprep.mubr.msk.f32.mxu0 %vm124_vm0, %v122_v2  ;;  %v123_v5 = vld [vmem:[#allocation5 + $0x8] sm:$0xff]  ;;  %v929_v7 = vld [vmem:[%s1428_s3] ss:$0 sm:$0xff]  ;;  %v308_v17 = vshrl.u32 %v307_v16, 7  ;;  %vm300_vm4 = vcmask 1043456   ;;  %v302_v23 = vld [vmem:[#allocation8] sm:$0xff] }
  0x3f   :  { %987 = vmatprep.subr.msk.mxu0 %vm124_vm0, %v110_v1  ;;  %1000 = vmatprep.mubr.msk.f32.mxu1 %vm1224_vm1, %v1223_v6  ;;  %v220_v11 = vld [vmem:[#allocation7] sm:$0xf]  ;;  %v303_v24 = vld [vmem:[#allocation8 + $0x8] sm:$0xff]  ;;  %v501_v45 = vld [vmem:[%s1431_s6 + $0x18] sm:$0xff]  ;;  %vm495_vm5 = vcmask 64512   ;;  %vm902_vm6 = vcmask 25600  }
  0x40   :  { %118 = vrot.lane.b32.xlu0 %v929_v7, %s1225_s30  ;;  %v112_v14 = vld [vmem:[%s1427_s2] sm:$0x1]  ;;  %v309_v20 = vsub.s32 0, %v308_v17  ;;  %v419_v44 = vld [vmem:[#allocation10 + $0x18] sm:$0xff]  ;;  %v418_v55 = vld [vmem:[#allocation10 + $0x10] sm:$0xff]  ;;  %vm821_vm7 = vcmask 1041408  }
  0x41   :  { %v500_v46 = vld [vmem:[%s1431_s6 + $0x10] sm:$0xff]  ;;  %v499_v47 = vld [vmem:[%s1431_s6 + $0x8] sm:$0xff]  ;;  %v498_v48 = vld [vmem:[%s1431_s6] sm:$0xff]  ;;  %vm823_vm8 = vcmask 257024  }
  0x42   :  { %988 = vmatpush3.xpose.msk.msra.mxu0 %vm124_vm0, %v110_v1  ;;  %v417_v56 = vld [vmem:[#allocation10 + $0x8] sm:$0xff]  ;;  %v416_v57 = vld [vmem:[#allocation10] sm:$0xff] }
  0x43   :  { %989 = vmatprep.subr.msk.mxu0 %vm124_vm0, %v109_v3  ;;  %v594_v7 = vld [vmem:[%s1434_s9] sm:$0x3] }
  0x46   :  { %990 = vmatpush3.xpose.msk.msra.mxu0 %vm124_vm0, %v109_v3 }
  0x47   :  { %991 = vmatprep.subr.msk.mxu0 %vm124_vm0, %v108_v4 }
  0x4a   :  { %992 = vmatpush3.xpose.msk.msra.mxu0 %vm124_vm0, %v108_v4 }
  0x4b   :  { %1025 = vmatprep.subr.mxu0 %v1223_v6 }
  0x4d   :  { %994 = vmatmul.mubr.msk.f32.vlgmr.msra.gmra.mxu0 %vm124_vm0, %v123_v5  ;;  %v826_v5 = vld [vmem:[%s1435_s10] sm:$0xff] }
  0x4e   :  { %1033 = vmatprep.mubr.msk.f32.mxu0 %vm1224_vm1, %v1223_v6  ;;  %1026 = vmatpush3.xpose.msk.msra.mxu0 %vm124_vm0, %v501_v45 }
  0x4f   :  { %1027 = vmatprep.subr.mxu0 %v1223_v6 }
  0x52   :  { %1028 = vmatpush3.xpose.msk.msra.mxu0 %vm124_vm0, %v500_v46 }
  0x53   :  { %1029 = vmatprep.subr.mxu0 %v1223_v6 }
  0x56   :  { %1030 = vmatpush3.xpose.msk.msra.mxu0 %vm124_vm0, %v499_v47 }
  0x57   :  { %1031 = vmatprep.subr.mxu0 %v1223_v6 }
  0x5a   :  { %1032 = vmatpush3.xpose.msk.msra.mxu0 %vm124_vm0, %v498_v48 }
  0x5b   :  { %1051 = vmatprep.subr.mxu0 %v1223_v6 }
  0xb2   :  { %v119_v13 = vpop.permute.xlu0 %118 }
  0xb3   :  { %v121_v15 = vsel %vm120_vm2, %v112_v14, %v119_v13  ;;  %v1226_v13 = vmov 0  }
  0xb4   :  { %vm294_vm3 = vcmp.eq.s32.totalorder %v121_v15, 0  ;;  %1068 = vset.pattern.permute.xlu1 %v1226_v13  ;;  %1069 = vset.pattern.permute.xlu0 %v1226_v13 }
  0xb5   :  { %v937_v18 = vsel %vm294_vm3, 1.0, %v1223_v6 }
  0xb6   :  { %v306_v19 = vmul.f32 10000.0, %v937_v18 }
  0xb8   :  { %v310_v26 = vrot.slane %v306_v19, %v309_v20 }
 0x10d   :  { %v995_v8 = vpop.f32.mrf.mxu0 }
 0x10e   :  { %1070 = vtanh.f32 %v995_v8 }
 0x10f   :  { %v209_v9 = vpop.f32.mrf.mxu0 }
 0x110   :  { %1072 = vtanh.f32 %v209_v9 }
 0x11b   :  { %v1071_v10 = vpop.eup %1070 }
 0x11c   :  { %997 = vmatpush3.msra.mxu1 %v1071_v10 }
 0x11d   :  { %v1073_v12 = vpop.eup %1072  ;;  %998 = vmatprep.subr.mxu1 %v1223_v6 }
 0x11e   :  { %999 = vmatpush3.msra.mxu1 %v1073_v12 }
 0x11f   :  { %1001 = vmatmul.mubr.msk.f32.vlgmr.msra.gmra.mxu1 %vm120_vm2, %v220_v11  ;;  %1003 = vmatprep.subr.mxu1 %v111_v0  ;;  %v825_v11 = vld [vmem:[%s1434_s9] sm:$0x3]  ;;  %s1227_s9 = smov [#allocation11]  }
 0x120   :  { %1004 = vmatpush3.msra.mxu1 %v111_v0  ;;  %s914_s10 = sshll.u32 %s1227_s9, 4  ;;  %s915_s10 = int_to_ptr.vmem [resolvable:$true] %s914_s10 }
 0x121   :  { %1005 = vmatprep.subr.mxu1 %v110_v1  ;;  %s1188_s5 = scalar_lea.vmem %s915_s10, 32  ;;  %p1193_p12 = scmp.lt.s32.totalorder %s915_s10, %s915_s10 }
 0x122   :  { %1006 = vmatpush3.msra.mxu1 %v110_v1  ;;  %p1189_p11 = scmp.ne.s32.totalorder %s915_s10, %s1188_s5  ;;  %p1194_p13 = scmp.lt.s32.totalorder %s1188_s5, %s1188_s5 }
 0x123   :  { %1007 = vmatprep.subr.mxu1 %v109_v3 }
 0x124   :  { %1008 = vmatpush3.msra.mxu1 %v109_v3  ;;  %p1195_p0 = por %p1194_p13, %p1193_p12 }
 0x125   :  { %1009 = vmatprep.subr.mxu1 %v108_v4 }
 0x126   :  { %1010 = vmatpush3.msra.mxu1 %v108_v4  ;;  %p1196_p1 = pnand %p1195_p0, %p1189_p11 }
 0x127   :  { %1014 = vmatprep.subr.mxu1 %v419_v44 }
 0x1df   :  { %v290_v21 = vpop.f32.mrf.mxu1 }
 0x1e0   :  { %v298_v22 = vrot.slane %v290_v21, 4 }
 0x1e1   :  { %v1002_v25 = vpop.f32.mrf.mxu1 }
 0x1e2   :  { %v301_v27 = vsel %vm300_vm4, %v290_v21, %v298_v22 }
 0x1e3   :  { %v304_v28 = vadd.f32 %v302_v23, %v301_v27  ;;  %v305_v29 = vadd.f32 %v303_v24, %v301_v27 }
 0x1e5   :  { %v312_v30 = vsub.f32 %v305_v29, %v310_v26  ;;  %v311_v31 = vsub.f32 %v304_v28, %v310_v26 }
 0x1e7   :  { %v316_v32 = vsel %vm124_vm0, %v312_v30, -inf  ;;  %v313_v33 = vsel %vm124_vm0, %v311_v31, -inf }
 0x1e8   :  { %317 = vmax.xlane.f32.xlu1 %v316_v32  ;;  %314 = vmax.xlane.f32.xlu0 %v313_v33 }
 0x271   :  { %v318_v34 = vpop.xlane.xlu1 %317  ;;  %v315_v35 = vpop.xlane.xlu0 %314 }
 0x272   :  { %v320_v36 = vsub.f32 %v312_v30, %v318_v34  ;;  %v319_v37 = vsub.f32 %v311_v31, %v315_v35 }
 0x274   :  { %v321_v38 = vmul.f32 1.442695, %v319_v37  ;;  %v323_v39 = vmul.f32 1.442695, %v320_v36 }
 0x276   :  { %1074 = vpow2.f32 %v321_v38 }
 0x277   :  { %1076 = vpow2.f32 %v323_v39 }
 0x283   :  { %v1075_v40 = vpop.eup %1074 }
 0x284   :  { %v325_v41 = vsel %vm124_vm0, %v1075_v40, 0.0  ;;  %v1077_v42 = vpop.eup %1076 }
 0x285   :  { %326 = vadd.xlane.f32.xlu1 %v325_v41  ;;  %v328_v43 = vsel %vm124_vm0, %v1077_v42, 0.0 }
 0x289   :  { %329 = vadd.xlane.f32.xlu1 %v328_v43 }
 0x30e   :  { %v327_v49 = vpop.xlane.xlu1 %326 }
 0x30f   :  { %1078 = vrcp.f32 %v327_v49 }
 0x312   :  { %v330_v50 = vpop.xlane.xlu1 %329 }
 0x313   :  { %1080 = vrcp.f32 %v330_v50 }
 0x31c   :  { %v1079_v51 = vpop.eup %1078 }
 0x31d   :  { %v333_v52 = vmul.f32 %v1079_v51, %v1075_v40 }
 0x31f   :  { %1011 = vmatprep.mubr.msk.f32.mxu1 %vm124_vm0, %v333_v52 }
 0x320   :  { %v1081_v53 = vpop.eup %1080 }
 0x321   :  { %v334_v54 = vmul.f32 %v1081_v53, %v1077_v42 }
 0x323   :  { %1012 = vmatmul.mubr.msk.f32.vlgmr.msra.gmra.mxu1 %vm124_vm0, %v334_v54 }
 0x324   :  { %1015 = vmatpush3.msra.mxu1 %v419_v44  ;;  %1022 = vmatprep.mubr.msk.f32.mxu1 %vm124_vm0, %v333_v52 }
 0x325   :  { %1016 = vmatprep.subr.mxu1 %v418_v55 }
 0x326   :  { %1017 = vmatpush3.msra.mxu1 %v418_v55 }
 0x327   :  { %1018 = vmatprep.subr.mxu1 %v417_v56 }
 0x328   :  { %1019 = vmatpush3.msra.mxu1 %v417_v56 }
 0x329   :  { %1020 = vmatprep.subr.mxu1 %v416_v57 }
 0x32a   :  { %1021 = vmatpush3.msra.mxu1 %v416_v57 }
 0x32b   :  { %1023 = vmatmul.mubr.msk.f32.vlgmr.msra.gmra.mxu1 %vm124_vm0, %v334_v54  ;;  %1036 = vmatprep.subr.mxu1 %v1223_v6 }
 0x32c   :  { %1038 = vmatprep.mubr.msk.f32.mxu1 %vm1224_vm1, %v1223_v6 }
 0x3e3   :  { %v1013_v58 = vpop.f32.mrf.mxu1 }
 0x3e4   :  { %1034 = vmatmul.mubr.msk.f32.vlgmr.msra.gmra.mxu0 %vm124_vm0, %v1013_v58 }
 0x3e5   :  { %1053 = vmatprep.mubr.msk.f32.mxu0 %vm1224_vm1, %v1223_v6  ;;  %v407_v59 = vpop.f32.mrf.mxu1 }
 0x3eb   :  { %v1024_v60 = vpop.f32.mrf.mxu1 }
 0x3ec   :  { %497 = vst.msk [vmem:[%s1436_s11 + $0x8] sm:$0xff] %vm495_vm5, %v1024_v60 }
 0x3ed   :  { %v486_v61 = vpop.f32.mrf.mxu1 }
 0x3ee   :  { %496 = vst.msk [vmem:[%s1436_s11] sm:$0xff] %vm495_vm5, %v486_v61 }
 0x4a4   :  { %v583_v62 = vpop.f32.mrf.mxu0 }
 0x4a5   :  { %v587_v63 = vmul.f32 %v583_v62, %v407_v59 }
 0x4a6   :  { %v1035_v0 = vpop.f32.mrf.mxu0 }
 0x4a7   :  { %v588_v1 = vsel %vm124_vm0, %v587_v63, 0.0 }
 0x4a8   :  { %589 = vadd.xlane.f32.xlu1 %v588_v1 }
 0x531   :  { %v590_v2 = vpop.xlane.xlu1 %589 }
 0x532   :  { %1082 = vtanh.f32 %v590_v2 }
 0x53f   :  { %v1083_v3 = vpop.eup %1082 }
 0x540   :  { %v592_v4 = vmul.f32 1.442695, %v1083_v3 }
 0x542   :  { %1084 = vpow2.f32 %v592_v4 }
 0x54f   :  { %v1085_v8 = vpop.eup %1084 }
 0x550   :  { %1037 = vmatpush3.msra.mxu1 %v1085_v8  ;;  %v669_v9 = vmul.f32 %v1085_v8, %v407_v59  ;;  %v827_v10 = vmul.f32 %v1085_v8, %v826_v5  ;;  %v746_v12 = vmul.f32 %v1085_v8, %v1013_v58 }
 0x551   :  { %1039 = vmatmul.mubr.msk.f32.vlgmr.msra.gmra.mxu1 %vm495_vm5, %v594_v7  ;;  %1041 = vmatprep.subr.mxu1 %v1223_v6 }
 0x552   :  { %1042 = vmatpush3.msra.mxu1 %v669_v9  ;;  %1052 = vmatpush3.msra.mxu0 %v827_v10 }
 0x553   :  { %1043 = vmatprep.mubr.msk.f32.mxu1 %vm1224_vm1, %v1223_v6  ;;  %1046 = vmatprep.subr.mxu1 %v1223_v6 }
 0x554   :  { %1054 = vmatmul.mubr.msk.f32.vlgmr.msra.gmra.mxu0 %vm495_vm5, %v825_v11 }
 0x555   :  { %1044 = vmatmul.mubr.msk.f32.vlgmr.msra.gmra.mxu1 %vm495_vm5, %v594_v7 }
 0x556   :  { %1047 = vmatpush3.msra.mxu1 %v746_v12  ;;  %1048 = vmatprep.mubr.msk.f32.mxu1 %vm1224_vm1, %v1223_v6 }
 0x559   :  { %1049 = vmatmul.mubr.msk.f32.vlgmr.msra.gmra.mxu1 %vm495_vm5, %v594_v7 }
 0x611   :  { %v664_v14 = vpop.f32.mrf.mxu1 }
 0x612   :  { %1086 = vrcp.f32 %v664_v14 }
 0x613   :  { %v1040_v15 = vpop.f32.mrf.mxu1 }
 0x614   :  { %v897_v20 = vpop.f32.mrf.mxu0 }
 0x615   :  { %v736_v16 = vpop.f32.mrf.mxu1 }
 0x616   :  { %v1055_v21 = vpop.f32.mrf.mxu0 }
 0x617   :  { %v1045_v17 = vpop.f32.mrf.mxu1 }
 0x619   :  { %v813_v18 = vpop.f32.mrf.mxu1 }
 0x61b   :  { %v1050_v19 = vpop.f32.mrf.mxu1 }
 0x61f   :  { %v1087_v22 = vpop.eup %1086 }
 0x620   :  { %742 = vperm.xlu1 %1068, %v1087_v22  }
 0x69b   :  { %v743_v23 = vpop.permute.xlu1 %742 }
 0x69c   :  { %v817_v6 = vmul.f32 %v813_v18, %v743_v23  ;;  %v901_v24 = vmul.f32 %v897_v20, %v743_v23  ;;  %v745_v25 = vmul.f32 %v743_v23, %v736_v16 }
 0x69e   :  { %v819_v26 = vrot.slane %v817_v6, 6  ;;  %903 = vst.msk [vmem:[#allocation11] sm:$0x3] %vm902_vm6, %v901_v24 }
 0x69f   :  { %1199 = shalt.err (!%p1196_p1)
}
 0x6a0   :  { %917 = dma.vmem_to_hbm [thread:$0]  %s915_s10, 32, %s1438_s13, [#allocation4]   ;;  %v822_v27 = vsel %vm821_vm7, %v745_v25, %v819_v26 }
 0x6a1   :  { %824 = vst.msk [vmem:[%s1437_s12] sm:$0xf] %vm823_vm8, %v822_v27 }
 0x6a2   :  { %1214 = dma.done.wait [#allocation4], 32  }
 0x6a3   :  { %1215 = vsyncadd [#allocation4], 4294967264 }
 0x6a4   :  { %925 = vsyncpa [#allocation3], 1 }
 0x6a5   :  { %926 = vsyncpa [#allocation6], 1 }
 0x6a6   :  { %927 = vsyncpa [#allocation9], 1 }
 0x6a7   :  { %928 = vsyncpa [#allocation4], 1 }

</bundles_post_ra>
